<compile_context>
chip_gen: v7x
topology: tpu7x:2x2x1
jax: 0.10.0
libtpu: 0.0.40
codegen_flags: <defaults>
</compile_context>

<pallas_src>
import jax
import jax.numpy as jnp
from jax.experimental import pallas as pl
from jax.experimental.pallas import tpu as pltpu

IN_FEATURES = 784   # 1 * 28 * 28
HIDDEN = 128
OUT_FEATURES = 10

_INV_SQRT2 = 0.7071067811865475


def _round_up(x, m):
    return ((x + m - 1) // m) * m


def _linearnet_kernel(x_ref, w1_ref, b1_ref, w2_ref, b2_ref, o_ref):
    # x_ref:  [TB, 784] f32      w1_ref: [784, 128] bf16   b1_ref: [1, 128] f32
    # w2_ref: [128, 10] bf16     b2_ref: [1, 10]    f32    o_ref:  [TB, 10] f32
    # Cast to bf16 at the MXU input only (f32 never leaves VMEM for this).
    x_bf16 = x_ref[...].astype(jnp.bfloat16)
    h = jnp.dot(x_bf16, w1_ref[...],
                preferred_element_type=jnp.float32) + b1_ref[...]

    # Exact erf-GELU in f32 (matches torch.nn.GELU default; f32 keeps the
    # VPU on its native width on all generations, incl. v5e).
    g = 0.5 * h * (1.0 + jax.lax.erf(h * _INV_SQRT2))

    out = jnp.dot(g.astype(jnp.bfloat16), w2_ref[...],
                  preferred_element_type=jnp.float32) + b2_ref[...]
    o_ref[...] = out.astype(o_ref.dtype)


def prepare_params(w1, b1, w2, b2):
    """One-time cast/reshape of parameters (hoisted out of the per-call path)."""
    return (w1.astype(jnp.bfloat16),
            b1.reshape(1, HIDDEN).astype(jnp.float32),
            w2.astype(jnp.bfloat16),
            b2.reshape(1, OUT_FEATURES).astype(jnp.float32))


def linearnet_forward(x_nchw, params, *, block_b=1024):
    """x_nchw: [B, 1, 28, 28] float32 -> logits [B, 10] float32."""
    w1_bf16, b1_2d, w2_bf16, b2_2d = params
    B = x_nchw.shape[0]
    x2d = x_nchw.reshape(B, IN_FEATURES)     # FlattenCOB: contiguous reshape (no HBM pass)

    # Batch tile: multiple of 8, >= 4 tiles at large B (v7x 2-TC sharding),
    # <= 1024 (v5e/v6e roofline), never wildly larger than B itself.
    TB = min(block_b,
             _round_up(pl.cdiv(B, 4), 16),
             _round_up(B, 8))
    TB = max(TB, 8)
    grid = (pl.cdiv(B, TB),)                 # ragged final tile handled by Pallas

    # VMEM budget derived from the actual footprint (double-buffered tiles +
    # resident weights) with headroom, instead of requesting the full chip VMEM.
    vmem_est = (2 * TB * IN_FEATURES * 4
                + 2 * TB * OUT_FEATURES * 4
                + 2 * (IN_FEATURES * HIDDEN + HIDDEN * OUT_FEATURES) * 2
                + 2 * (HIDDEN + OUT_FEATURES) * 4)
    vmem_limit = int(min(max(2 * vmem_est, 8 << 20), 32 << 20))

    cost = pl.CostEstimate(
        flops=2 * B * (IN_FEATURES * HIDDEN + HIDDEN * OUT_FEATURES),
        transcendentals=B * HIDDEN,
        bytes_accessed=(B * IN_FEATURES * 4              # x f32
                        + IN_FEATURES * HIDDEN * 2       # w1 bf16
                        + HIDDEN * OUT_FEATURES * 2      # w2 bf16
                        + (HIDDEN + OUT_FEATURES) * 4    # biases f32
                        + B * OUT_FEATURES * 4),         # out f32
    )

    out = pl.pallas_call(
        _linearnet_kernel,
        out_shape=jax.ShapeDtypeStruct((B, OUT_FEATURES), jnp.float32),
        grid_spec=pl.GridSpec(
            grid=grid,
            in_specs=[
                pl.BlockSpec((TB, IN_FEATURES), lambda i: (i, 0)),        # x tile
                pl.BlockSpec((IN_FEATURES, HIDDEN), lambda i: (0, 0)),    # w1 resident
                pl.BlockSpec((1, HIDDEN), lambda i: (0, 0)),              # b1 resident
                pl.BlockSpec((HIDDEN, OUT_FEATURES), lambda i: (0, 0)),   # w2 resident
                pl.BlockSpec((1, OUT_FEATURES), lambda i: (0, 0)),        # b2 resident
            ],
            out_specs=pl.BlockSpec((TB, OUT_FEATURES), lambda i: (i, 0)),
        ),
        compiler_params=pltpu.CompilerParams(
            dimension_semantics=("parallel",),   # batch axis -> v7x 2-TC sharding
            vmem_limit_bytes=vmem_limit,
        ),
        cost_estimate=cost,
    )(x2d, w1_bf16, b1_2d, w2_bf16, b2_2d)

    return out


def init_params(key):
    """Deterministic init matching nn.Linear shapes (kaiming-uniform-like)."""
    k1, k2, k3, k4 = jax.random.split(key, 4)
    bound1 = 1.0 / jnp.sqrt(IN_FEATURES)
    bound2 = 1.0 / jnp.sqrt(HIDDEN)
    # Stored already transposed ([in, out]) so the kernel does x @ W.
    w1 = jax.random.uniform(k1, (IN_FEATURES, HIDDEN), jnp.float32, -bound1, bound1)
    b1 = jax.random.uniform(k2, (HIDDEN,), jnp.float32, -bound1, bound1)
    w2 = jax.random.uniform(k3, (HIDDEN, OUT_FEATURES), jnp.float32, -bound2, bound2)
    b2 = jax.random.uniform(k4, (OUT_FEATURES,), jnp.float32, -bound2, bound2)
    return w1, b1, w2, b2


def _ref_forward(x_nchw, w1, b1, w2, b2, *, quantize):
    """Pure-JAX reference. quantize=True mirrors the kernel's bf16 MXU inputs."""
    hp = jax.lax.Precision.HIGHEST
    x2d = x_nchw.reshape(x_nchw.shape[0], -1)
    if quantize:
        x2d = x2d.astype(jnp.bfloat16).astype(jnp.float32)
        w1 = w1.astype(jnp.bfloat16).astype(jnp.float32)
        w2 = w2.astype(jnp.bfloat16).astype(jnp.float32)
    h = jnp.dot(x2d, w1, precision=hp) + b1
    g = 0.5 * h * (1.0 + jax.lax.erf(h * _INV_SQRT2))
    if quantize:
        g = g.astype(jnp.bfloat16).astype(jnp.float32)
    return jnp.dot(g, w2, precision=hp) + b2


if __name__ == "__main__":
    key = jax.random.PRNGKey(0)
    kx1, kx2, kp = jax.random.split(key, 3)

    w1, b1, w2, b2 = init_params(kp)
    params = prepare_params(w1, b1, w2, b2)   # one-time bf16 cast / bias reshape

    # Case 1: small, tile-aligned batch.
    B1 = 8
    x1 = jax.random.normal(kx1, (B1, 1, 28, 28), jnp.float32)  # MNIST-like NCHW
    out1 = jax.block_until_ready(linearnet_forward(x1, params))
    assert out1.shape == (B1, OUT_FEATURES)

    # Case 2: ragged batch (exercises multiple tiles + clipped final block).
    B2 = 20
    x2 = jax.random.normal(kx2, (B2, 1, 28, 28), jnp.float32)
    out2 = jax.block_until_ready(linearnet_forward(x2, params, block_b=16))
    assert out2.shape == (B2, OUT_FEATURES)

    for x, out in ((x1, out1), (x2, out2)):
        # Tight check against a reference with identical bf16 quantization.
        ref_q = _ref_forward(x, w1, b1, w2, b2, quantize=True)
        assert jnp.allclose(out, ref_q, atol=2e-3, rtol=2e-3)
        # Loose sanity check against the full-f32 PyTorch-equivalent reference.
        ref_f32 = _ref_forward(x, w1, b1, w2, b2, quantize=False)
        assert jnp.allclose(out, ref_f32, atol=1e-1, rtol=1e-1)

    print("KERNEL_OK")
</pallas_src>

<mosaic_0001>
module attributes {stable_mosaic.version = 11 : i64} {
  func.func @_linearnet_kernel(%arg0: i32, %arg1: memref<8x784xf32, #tpu.memory_space<vmem>>, %arg2: memref<784x128xbf16, #tpu.memory_space<vmem>>, %arg3: memref<1x128xf32, #tpu.memory_space<vmem>>, %arg4: memref<128x10xbf16, #tpu.memory_space<vmem>>, %arg5: memref<1x10xf32, #tpu.memory_space<vmem>>, %arg6: memref<8x10xf32, #tpu.memory_space<vmem>>) attributes {dimension_semantics = [#tpu.dimension_semantics<parallel>], iteration_bounds = array<i64: 1>, scalar_prefetch = 0 : i64, scratch_operands = 0 : i64, tpu.core_type = #tpu.core_type<tc>, window_params = [{transform_indices = @transform_0, window_bounds = array<i64: 8, 784>}, {pipeline_mode = #tpu.pipeline_mode<synchronous>, transform_indices = @transform_1, window_bounds = array<i64: 784, 128>}, {pipeline_mode = #tpu.pipeline_mode<synchronous>, transform_indices = @transform_2, window_bounds = array<i64: 1, 128>}, {pipeline_mode = #tpu.pipeline_mode<synchronous>, transform_indices = @transform_3, window_bounds = array<i64: 128, 10>}, {pipeline_mode = #tpu.pipeline_mode<synchronous>, transform_indices = @transform_4, window_bounds = array<i64: 1, 10>}, {transform_indices = @transform_5, window_bounds = array<i64: 8, 10>}]} {
    %c0 = arith.constant 0 : index
    %c0_0 = arith.constant 0 : index
    %0 = vector.load %arg1[%c0, %c0_0] : memref<8x784xf32, #tpu.memory_space<vmem>>, vector<8x784xf32>
    %1 = arith.truncf %0 : vector<8x784xf32> to vector<8x784xbf16>
    %c0_1 = arith.constant 0 : index
    %c0_2 = arith.constant 0 : index
    %2 = vector.load %arg2[%c0_1, %c0_2] : memref<784x128xbf16, #tpu.memory_space<vmem>>, vector<784x128xbf16>
    %cst = arith.constant dense<0.000000e+00> : vector<8x128xf32>
    %3 = tpu.matmul %1, %2, %cst {dimension_numbers = #tpu.dot_dimension_numbers<[1], [0], [0], [1], [0, 0, 1, 1], [], []>} : vector<8x784xbf16>, vector<784x128xbf16>, vector<8x128xf32> -> vector<8x128xf32>
    %c0_3 = arith.constant 0 : index
    %c0_4 = arith.constant 0 : index
    %4 = vector.load %arg3[%c0_3, %c0_4] : memref<1x128xf32, #tpu.memory_space<vmem>>, vector<1x128xf32>
    %5 = vector.broadcast %4 : vector<1x128xf32> to vector<8x128xf32>
    %6 = arith.addf %3, %5 : vector<8x128xf32>
    %cst_5 = arith.constant 5.000000e-01 : f32
    %7 = vector.broadcast %cst_5 : f32 to vector<8x128xf32>
    %8 = arith.mulf %7, %6 : vector<8x128xf32>
    %cst_6 = arith.constant 0.707106769 : f32
    %9 = vector.broadcast %cst_6 : f32 to vector<8x128xf32>
    %10 = arith.mulf %6, %9 : vector<8x128xf32>
    %11 = math.erf %10 : vector<8x128xf32>
    %cst_7 = arith.constant 1.000000e+00 : f32
    %12 = vector.broadcast %cst_7 : f32 to vector<8x128xf32>
    %13 = arith.addf %12, %11 : vector<8x128xf32>
    %14 = arith.mulf %8, %13 : vector<8x128xf32>
    %15 = arith.truncf %14 : vector<8x128xf32> to vector<8x128xbf16>
    %c0_8 = arith.constant 0 : index
    %c0_9 = arith.constant 0 : index
    %16 = vector.load %arg4[%c0_8, %c0_9] : memref<128x10xbf16, #tpu.memory_space<vmem>>, vector<128x10xbf16>
    %cst_10 = arith.constant dense<0.000000e+00> : vector<8x10xf32>
    %17 = tpu.matmul %15, %16, %cst_10 {dimension_numbers = #tpu.dot_dimension_numbers<[1], [0], [0], [1], [0, 0, 1, 1], [], []>} : vector<8x128xbf16>, vector<128x10xbf16>, vector<8x10xf32> -> vector<8x10xf32>
    %c0_11 = arith.constant 0 : index
    %c0_12 = arith.constant 0 : index
    %18 = vector.load %arg5[%c0_11, %c0_12] : memref<1x10xf32, #tpu.memory_space<vmem>>, vector<1x10xf32>
    %19 = vector.broadcast %18 : vector<1x10xf32> to vector<8x10xf32>
    %20 = arith.addf %17, %19 : vector<8x10xf32>
    %c0_13 = arith.constant 0 : index
    %c0_14 = arith.constant 0 : index
    %21 = vector.load %arg6[%c0_13, %c0_14] : memref<8x10xf32, #tpu.memory_space<vmem>>, vector<8x10xf32>
    tpu.vector_store %arg6[%c0_13, %c0_14], %20 {strides = array<i32>} : memref<8x10xf32, #tpu.memory_space<vmem>>, vector<8x10xf32>,
    return
  }
  func.func @transform_0(%arg0: i32) -> (i32, i32) {
    %c0_i32 = arith.constant 0 : i32
    %c0_i32_0 = arith.constant 0 : i32
    return %arg0, %c0_i32 : i32, i32
  }
  func.func @transform_1(%arg0: i32) -> (i32, i32) {
    %c0_i32 = arith.constant 0 : i32
    %c0_i32_0 = arith.constant 0 : i32
    %c0_i32_1 = arith.constant 0 : i32
    return %c0_i32, %c0_i32_0 : i32, i32
  }
  func.func @transform_2(%arg0: i32) -> (i32, i32) {
    %c0_i32 = arith.constant 0 : i32
    %c0_i32_0 = arith.constant 0 : i32
    %c0_i32_1 = arith.constant 0 : i32
    return %c0_i32, %c0_i32_0 : i32, i32
  }
  func.func @transform_3(%arg0: i32) -> (i32, i32) {
    %c0_i32 = arith.constant 0 : i32
    %c0_i32_0 = arith.constant 0 : i32
    %c0_i32_1 = arith.constant 0 : i32
    return %c0_i32, %c0_i32_0 : i32, i32
  }
  func.func @transform_4(%arg0: i32) -> (i32, i32) {
    %c0_i32 = arith.constant 0 : i32
    %c0_i32_0 = arith.constant 0 : i32
    %c0_i32_1 = arith.constant 0 : i32
    return %c0_i32, %c0_i32_0 : i32, i32
  }
  func.func @transform_5(%arg0: i32) -> (i32, i32) {
    %c0_i32 = arith.constant 0 : i32
    %c0_i32_0 = arith.constant 0 : i32
    return %arg0, %c0_i32 : i32, i32
  }
}

</mosaic_0001>

<bundles_post_ra>
// kernel: tpu_custom_call.1
= control target key start
LH: loop header
LB: loop body
LE: loop exit
PB: predicated region body
PF: predicated region fallthrough
CT: control target
= control target key end

     0   :  { %10 = vsyncpa [#allocation3], 0  ;;  %s1147_s0 = inlined_call_operand.vmem [shape: f32[8,784], index: 0, kind: input, shape index: {}]   ;;  %s1148_s1 = inlined_call_operand.hbm [shape: bf16[784,128], index: 1, kind: input, shape index: {}]   ;;  %s1149_s2 = inlined_call_operand.vmem [shape: f32[1,128], index: 2, kind: input, shape index: {}]   ;;  %s1150_s3 = inlined_call_operand.vmem [shape: bf16[128,10], index: 3, kind: input, shape index: {}]   ;;  %s1151_s4 = inlined_call_operand.vmem [shape: f32[1,10], index: 4, kind: input, shape index: {}]   ;;  %s1152_s5 = inlined_call_operand.hbm [shape: f32[8,10], index: 5, kind: output, shape index: {}]  }
   0x1   :  { %11 = vsyncpa [#allocation4], 0  ;;  %s1023_s18 = smov [#allocation2]   ;;  %s975_s22 = scalar_lea.hbm %s1148_s1, 6272 }
   0x2   :  { %s19_s19 = sshll.u32 %s1023_s18, 4  ;;  %p976_p0 = scmp.ne.s32.totalorder %s1148_s1, %s975_s22  ;;  %s20_s19 = int_to_ptr.vmem [resolvable:$true] %s19_s19 }
   0x3   :  { %p979_p1 = scmp.lt.u32.totalorder %s975_s22, %s1148_s1 }
   0x5   :  { %p981_p2 = pnand %p979_p1, %p976_p0 }
   0x7   :  { %984 = shalt.err (!%p981_p2)
}
   0x8   :  { %s985_s27 = scalar_lea.vmem %s20_s19, 6272  ;;  %p990_p4 = scmp.lt.s32.totalorder %s20_s19, %s20_s19 }
   0x9   :  { %p986_p3 = scmp.ne.s32.totalorder %s20_s19, %s985_s27  ;;  %p991_p5 = scmp.lt.s32.totalorder %s985_s27, %s985_s27 }
   0xb   :  { %p992_p6 = por %p991_p5, %p990_p4 }
   0xd   :  { %p993_p7 = pnand %p992_p6, %p986_p3 }
   0xf   :  { %996 = shalt.err (!%p993_p7)
}
  0x10   :  { %s1024_s28 = smov 64   ;;  %s1025_s29 = smov 4  }
  0x11   :  { %25 = dma.hbm_to_vmem [thread:$0]  %s1148_s1, 6272, %s20_s19, [#allocation3], %s1024_s28, %s1024_s28, %s1025_s29  }
  0x12   :  { %1019 = dma.done.wait [#allocation3], 6272  }
  0x13   :  { %1020 = vsyncadd [#allocation3], 4294961024  ;;  %v916_v0 = vld [vmem:[#allocation2 + $0x40] sm:$0xff]   ;;  %v920_v4 = vld [vmem:[#allocation2 + $0x48] sm:$0xff]   ;;  %v1026_v44 = vmov 0.0   ;;  %vm1027_vm0 = vmmov 0  }
  0x14   :  { %v917_v1 = vld [vmem:[#allocation2] sm:$0xff]   ;;  %807 = vmatprep.subr.bf16.mxu0 %v916_v0  ;;  %v921_v5 = vld [vmem:[#allocation2 + $0x8] sm:$0xff]   ;;  %v924_v8 = vld [vmem:[#allocation2 + $0x50] sm:$0xff]   ;;  %vm449_vm1 = vcmask 130048   ;;  %s1028_s11 = smov [#allocation5]   ;;  %vm730_vm2 = vcmask 80896  }
  0x15   :  { %v918_v2 = vld [vmem:[#allocation2 + $0xc0] sm:$0xff]   ;;  %808 = vmatpush3.bf16.msra.mxu0 %v917_v1  ;;  %v922_v6 = vld [vmem:[#allocation2 + $0xc8] sm:$0xff]   ;;  %v925_v9 = vld [vmem:[#allocation2 + $0x10] sm:$0xff]   ;;  %s738_s12 = sshll.u32 %s1028_s11, 4  ;;  %s739_s12 = int_to_ptr.vmem [resolvable:$true] %s738_s12 }
  0x16   :  { %v919_v3 = vld [vmem:[#allocation2 + $0x80] sm:$0xff]   ;;  %829 = vmatprep.subr.bf16.mxu1 %v918_v2  ;;  %809 = vmatprep.subr.bf16.mxu0 %v920_v4  ;;  %v923_v7 = vld [vmem:[#allocation2 + $0x88] sm:$0xff]   ;;  %v926_v10 = vld [vmem:[#allocation2 + $0xd0] sm:$0xff]   ;;  %s997_s13 = scalar_lea.vmem %s739_s12, 128  ;;  %p1002_p9 = scmp.lt.s32.totalorder %s739_s12, %s739_s12 }
  0x17   :  { %830 = vmatpush3.bf16.msra.mxu1 %v919_v3  ;;  %v927_v11 = vld [vmem:[#allocation2 + $0x90] sm:$0xff]   ;;  %v928_v12 = vld [vmem:[#allocation2 + $0x58] sm:$0xff]   ;;  %v932_v16 = vld [vmem:[#allocation2 + $0x60] sm:$0xff]   ;;  %p998_p8 = scmp.ne.s32.totalorder %s739_s12, %s997_s13  ;;  %p1003_p10 = scmp.lt.s32.totalorder %s997_s13, %s997_s13 }
  0x18   :  { %831 = vmatprep.subr.bf16.mxu1 %v922_v6  ;;  %v929_v13 = vld [vmem:[#allocation2 + $0x18] sm:$0xff]   ;;  %v933_v17 = vld [vmem:[#allocation2 + $0x20] sm:$0xff]   ;;  %v936_v20 = vld [vmem:[#allocation2 + $0x68] sm:$0xff]  }
  0x19   :  { %810 = vmatpush3.bf16.msra.mxu0 %v921_v5  ;;  %v930_v14 = vld [vmem:[#allocation2 + $0xd8] sm:$0xff]   ;;  %v934_v18 = vld [vmem:[#allocation2 + $0xe0] sm:$0xff]   ;;  %v937_v21 = vld [vmem:[#allocation2 + $0x28] sm:$0xff]   ;;  %p1004_p11 = por %p1003_p10, %p1002_p9 }
  0x1a   :  { %811 = vmatprep.subr.bf16.mxu0 %v924_v8  ;;  %v931_v15 = vld [vmem:[#allocation2 + $0x98] sm:$0xff]   ;;  %v935_v19 = vld [vmem:[#allocation2 + $0xa0] sm:$0xff]   ;;  %v938_v22 = vld [vmem:[#allocation2 + $0xe8] sm:$0xff]  }
  0x1b   :  { %832 = vmatpush3.bf16.msra.mxu1 %v923_v7  ;;  %v939_v23 = vld [vmem:[#allocation2 + $0xa8] sm:$0xff]   ;;  %v940_v24 = vld [vmem:[#allocation2 + $0x70] sm:$0xff]   ;;  %v944_v28 = vld [vmem:[#allocation2 + $0x78] sm:$0xff]   ;;  %p1005_p12 = pnand %p1004_p11, %p998_p8 }
  0x1c   :  { %833 = vmatprep.subr.bf16.mxu1 %v926_v10  ;;  %v941_v25 = vld [vmem:[#allocation2 + $0x30] sm:$0xff]   ;;  %v945_v29 = vld [vmem:[#allocation2 + $0x38] sm:$0xff]   ;;  %v37_v31 = vld [vmem:[%s1147_s0 + $0x8] sm:$0xff] }
  0x1d   :  { %812 = vmatpush3.bf16.msra.mxu0 %v925_v9  ;;  %v942_v26 = vld [vmem:[#allocation2 + $0xf0] sm:$0xff]   ;;  %v946_v30 = vld [vmem:[#allocation2 + $0xf8] sm:$0xff]   ;;  %v44_v32 = vpack.c.bf16 %v37_v31, %v37_v31  ;;  %v36_v34 = vld [vmem:[%s1147_s0] sm:$0xff] }
  0x1e   :  { %813 = vmatprep.subr.bf16.mxu0 %v928_v12  ;;  %v943_v27 = vld [vmem:[#allocation2 + $0xb0] sm:$0xff]   ;;  %v947_v33 = vld [vmem:[#allocation2 + $0xb8] sm:$0xff]   ;;  %v43_v35 = vpack.c.bf16 %v36_v34, %v36_v34  ;;  %v948_v36 = vld [vmem:[#allocation2 + $0x140] sm:$0xff]  }
  0x1f   :  { %834 = vmatpush3.bf16.msra.mxu1 %v927_v11  ;;  %v39_v37 = vld [vmem:[%s1147_s0 + $0x18] sm:$0xff]  ;;  %485 = vmatprep.mubr.bf16.mxu0 %v44_v32  ;;  %v949_v39 = vld [vmem:[#allocation2 + $0x100] sm:$0xff]   ;;  %v38_v40 = vld [vmem:[%s1147_s0 + $0x10] sm:$0xff] }
  0x20   :  { %835 = vmatprep.subr.bf16.mxu1 %v930_v14  ;;  %v46_v38 = vpack.c.bf16 %v39_v37, %v39_v37  ;;  %v45_v41 = vpack.c.bf16 %v38_v40, %v38_v40  ;;  %v950_v42 = vld [vmem:[#allocation2 + $0x148] sm:$0xff]   ;;  %v952_v45 = vld [vmem:[#allocation2 + $0x150] sm:$0xff]   ;;  %v954_v47 = vld [vmem:[#allocation2 + $0x158] sm:$0xff]  }
  0x21   :  { %814 = vmatpush3.bf16.msra.mxu0 %v929_v13  ;;  %v951_v43 = vld [vmem:[#allocation2 + $0x108] sm:$0xff]   ;;  %v953_v46 = vld [vmem:[#allocation2 + $0x110] sm:$0xff]   ;;  %v955_v48 = vld [vmem:[#allocation2 + $0x118] sm:$0xff]  }
  0x22   :  { %815 = vmatprep.subr.bf16.mxu0 %v932_v16  ;;  %525 = vmatprep.mubr.bf16.mxu1 %v46_v38  ;;  %v956_v49 = vld [vmem:[#allocation2 + $0x160] sm:$0xff]   ;;  %v958_v51 = vld [vmem:[#allocation2 + $0x168] sm:$0xff]   ;;  %v960_v55 = vld [vmem:[#allocation2 + $0x170] sm:$0xff]  }
  0x23   :  { %836 = vmatpush3.bf16.msra.mxu1 %v931_v15  ;;  %v957_v50 = vld [vmem:[#allocation2 + $0x120] sm:$0xff]   ;;  %v959_v52 = vld [vmem:[#allocation2 + $0x128] sm:$0xff]   ;;  %v42_v57 = vld [vmem:[%s1147_s0 + $0x30] sm:$0xff] }
  0x24   :  { %837 = vmatprep.subr.bf16.mxu1 %v934_v18  ;;  %v964_v53 = vld [vmem:[#allocation2 + $0x180] sm:$0xff]   ;;  %v41_v54 = vld [vmem:[%s1147_s0 + $0x28] sm:$0xff]  ;;  %v49_v58 = vpack.c.bf16 %v42_v57, %v42_v57  ;;  %v961_v59 = vld [vmem:[#allocation2 + $0x130] sm:$0xff]  }
  0x25   :  { %816 = vmatpush3.bf16.msra.mxu0 %v933_v17  ;;  %v48_v56 = vpack.c.bf16 %v41_v54, %v41_v54  ;;  %v962_v60 = vld [vmem:[#allocation2 + $0x178] sm:$0xff]   ;;  %v40_v62 = vld [vmem:[%s1147_s0 + $0x20] sm:$0xff]  ;;  %v966_v1 = vld [vmem:[%s1150_s3 + $0x8] sm:$0xff]  }
  0x26   :  { %817 = vmatprep.subr.bf16.mxu0 %v936_v20  ;;  %v963_v61 = vld [vmem:[#allocation2 + $0x138] sm:$0xff]   ;;  %v47_v63 = vpack.c.bf16 %v40_v62, %v40_v62  ;;  %v965_v0 = vld [vmem:[%s1150_s3] sm:$0xff]   ;;  %v967_v2 = vld [vmem:[%s1150_s3 + $0x10] sm:$0xff]  }
  0x27   :  { %838 = vmatpush3.bf16.msra.mxu1 %v935_v19  ;;  %v968_v3 = vld [vmem:[%s1150_s3 + $0x18] sm:$0xff]   ;;  %v969_v4 = vld [vmem:[%s1150_s3 + $0x20] sm:$0xff]   ;;  %v970_v5 = vld [vmem:[%s1150_s3 + $0x28] sm:$0xff]  }
  0x28   :  { %839 = vmatprep.subr.bf16.mxu1 %v938_v22  ;;  %v971_v6 = vld [vmem:[%s1150_s3 + $0x30] sm:$0xff]   ;;  %v972_v7 = vld [vmem:[%s1150_s3 + $0x38] sm:$0xff]   ;;  %v747_v9 = vld [vmem:[%s1149_s2] ss:$0 sm:$0xff] }
  0x29   :  { %818 = vmatpush3.bf16.msra.mxu0 %v937_v21  ;;  %v798_v38 = vld [vmem:[%s1151_s4] ss:$0 sm:$0xff] }
  0x2a   :  { %819 = vmatprep.subr.bf16.mxu0 %v940_v24 }
  0x2b   :  { %840 = vmatpush3.bf16.msra.mxu1 %v939_v23 }
  0x2c   :  { %841 = vmatprep.subr.bf16.mxu1 %v942_v26 }
  0x2d   :  { %820 = vmatpush3.bf16.msra.mxu0 %v941_v25 }
  0x2e   :  { %821 = vmatprep.subr.bf16.mxu0 %v944_v28 }
  0x2f   :  { %842 = vmatpush3.bf16.msra.mxu1 %v943_v27 }
  0x30   :  { %843 = vmatprep.subr.bf16.mxu1 %v946_v30 }
  0x31   :  { %822 = vmatpush3.bf16.msra.mxu0 %v945_v29 }
  0x32   :  { %851 = vmatprep.subr.bf16.mxu0 %v948_v36 }
  0x33   :  { %844 = vmatpush3.bf16.msra.mxu1 %v947_v33 }
  0x34   :  { %486 = vmatmul.mubr.bf16.vlgmr.msra.gmra.mrb[0].mxu0 %v43_v35  ;;  %884 = vmatprep.subr.bf16.mxu1 %v1026_v44 }
  0x35   :  { %852 = vmatpush3.bf16.msra.mxu0 %v949_v39  ;;  %565 = vmatprep.mubr.bf16.mxu0 %v48_v56 }
  0x36   :  { %526 = vmatmul.mubr.bf16.vlgmr.msra.gmra.mrb[0].mxu1 %v45_v41  ;;  %853 = vmatprep.subr.bf16.mxu0 %v950_v42 }
  0x37   :  { %886 = vmatprep.mubr.msk.bf16.mxu1 %vm1027_vm0, %v1026_v44  ;;  %885 = vmatpush3.bf16.msra.mxu1 %v964_v53 }
  0x38   :  { %890 = vmatprep.subr.bf16.mxu1 %v1026_v44 }
  0x39   :  { %854 = vmatpush3.bf16.msra.mxu0 %v951_v43 }
  0x3a   :  { %855 = vmatprep.subr.bf16.mxu0 %v952_v45 }
  0x3d   :  { %856 = vmatpush3.bf16.msra.mxu0 %v953_v46 }
  0x3e   :  { %857 = vmatprep.subr.bf16.mxu0 %v954_v47  ;;  %887 = vmatmul.mubr.msk.bf16.vlgmr.msra.gmra.mrb[4].mxu1 %vm449_vm1, %v49_v58 }
  0x3f   :  { %906 = vmatprep.mubr.msk.bf16.mxu1 %vm1027_vm0, %v1026_v44  ;;  %891 = vmatpush3.bf16.msra.mxu1 %v965_v0 }
  0x40   :  { %892 = vmatprep.subr.bf16.mxu1 %v1026_v44 }
  0x41   :  { %858 = vmatpush3.bf16.msra.mxu0 %v955_v48 }
  0x42   :  { %859 = vmatprep.subr.bf16.mxu0 %v956_v49 }
  0x43   :  { %893 = vmatpush3.bf16.msra.mxu1 %v966_v1 }
  0x44   :  { %894 = vmatprep.subr.bf16.mxu1 %v1026_v44 }
  0x45   :  { %860 = vmatpush3.bf16.msra.mxu0 %v957_v50 }
  0x46   :  { %861 = vmatprep.subr.bf16.mxu0 %v958_v51 }
  0x47   :  { %895 = vmatpush3.bf16.msra.mxu1 %v967_v2 }
  0x48   :  { %896 = vmatprep.subr.bf16.mxu1 %v1026_v44 }
  0x49   :  { %862 = vmatpush3.bf16.msra.mxu0 %v959_v52 }
  0x4a   :  { %863 = vmatprep.subr.bf16.mxu0 %v960_v55 }
  0x4b   :  { %897 = vmatpush3.bf16.msra.mxu1 %v968_v3 }
  0x4c   :  { %898 = vmatprep.subr.bf16.mxu1 %v1026_v44 }
  0x4d   :  { %864 = vmatpush3.bf16.msra.mxu0 %v961_v59 }
  0x4e   :  { %865 = vmatprep.subr.bf16.mxu0 %v962_v60 }
  0x4f   :  { %899 = vmatpush3.bf16.msra.mxu1 %v969_v4 }
  0x50   :  { %900 = vmatprep.subr.bf16.mxu1 %v1026_v44 }
  0x51   :  { %866 = vmatpush3.bf16.msra.mxu0 %v963_v61 }
  0x53   :  { %901 = vmatpush3.bf16.msra.mxu1 %v970_v5 }
  0x54   :  { %566 = vmatmul.mubr.bf16.vlgmr.msra.gmra.mrb[4].mxu0 %v47_v63  ;;  %902 = vmatprep.subr.bf16.mxu1 %v1026_v44 }
  0x57   :  { %903 = vmatpush3.bf16.msra.mxu1 %v971_v6 }
  0x58   :  { %904 = vmatprep.subr.bf16.mxu1 %v1026_v44 }
  0x5b   :  { %905 = vmatpush3.bf16.msra.mxu1 %v972_v7 }
 0x107   :  { %v823_v8 = vpop.f32.mrb[0].mxu0 }
 0x108   :  { %v824_v10 = vpop.f32.mrb[1].mxu0 }
 0x109   :  { %v825_v11 = vadd.f32 %v824_v10, %v823_v8  ;;  %v826_v12 = vpop.f32.mrb[2].mxu0  ;;  %v845_v13 = vpop.f32.mrb[0].mxu1 }
 0x10a   :  { %v827_v14 = vpop.f32.mrb[3].mxu0  ;;  %v846_v16 = vpop.f32.mrb[1].mxu1 }
 0x10b   :  { %v488_v15 = vadd.f32 %v825_v11, %v747_v9  ;;  %v847_v17 = vadd.f32 %v846_v16, %v845_v13  ;;  %v848_v18 = vpop.f32.mrb[2].mxu1 }
 0x10c   :  { %v849_v19 = vpop.f32.mrb[3].mxu1 }
 0x10d   :  { %v528_v20 = vadd.f32 %v847_v17, %v488_v15 }
 0x111   :  { %v607_v21 = vpop.f32.mrb[4].mxu1 }
 0x112   :  { %v888_v22 = vpop.f32.mrb[5].mxu1 }
 0x113   :  { %v610_v23 = vpop.f32.mrb[6].mxu1 }
 0x114   :  { %v889_v24 = vpop.f32.mrb[7].mxu1 }
 0x127   :  { %v867_v25 = vpop.f32.mrb[4].mxu0 }
 0x128   :  { %v868_v26 = vpop.f32.mrb[5].mxu0 }
 0x129   :  { %v869_v27 = vadd.f32 %v868_v26, %v867_v25  ;;  %v870_v28 = vpop.f32.mrb[6].mxu0 }
 0x12a   :  { %v871_v29 = vpop.f32.mrb[7].mxu0 }
 0x12b   :  { %v568_v30 = vadd.f32 %v869_v27, %v528_v20 }
 0x12d   :  { %v608_v31 = vadd.f32 %v607_v21, %v568_v30 }
 0x12f   :  { %v614_v32 = vmul.f32 0.70710677, %v608_v31  ;;  %v613_v34 = vmul.f32 0.5, %v608_v31 }
 0x131   :  { %973 = verf.f32 %v614_v32 }
 0x13b   :  { %v974_v33 = vpop.eup %973 }
 0x13c   :  { %v616_v35 = vadd.f32 1.0, %v974_v33 }
 0x13e   :  { %v617_v36 = vmul.f32 %v616_v35, %v613_v34 }
 0x140   :  { %v618_v37 = vpack.c.bf16 %v617_v36, %v617_v36 }
 0x142   :  { %907 = vmatmul.mubr.bf16.vlgmr.msra.gmra.mrb[8].mxu1 %v618_v37 }
 0x215   :  { %v724_v39 = vpop.f32.mrb[8].mxu1 }
 0x216   :  { %v725_v40 = vadd.f32 %v798_v38, %v724_v39  ;;  %v908_v41 = vpop.f32.mrb[9].mxu1 }
 0x217   :  { %v727_v42 = vpop.f32.mrb[10].mxu1 }
 0x218   :  { %v909_v43 = vpop.f32.mrb[11].mxu1  ;;  %731 = vst.msk [vmem:[#allocation5] sm:$0xff] %vm730_vm2, %v725_v40 }
 0x219   :  { %1008 = shalt.err (!%p1005_p12)
}
 0x21a   :  { %s1009_s4 = scalar_lea.hbm %s1152_s5, 128 }
 0x21b   :  { %p1010_p13 = scmp.ne.s32.totalorder %s1152_s5, %s1009_s4  ;;  %p1013_p0 = scmp.lt.u32.totalorder %s1009_s4, %s1152_s5 }
 0x21d   :  { %p1015_p1 = pnand %p1013_p0, %p1010_p13 }
 0x21f   :  { %1018 = shalt.err (!%p1015_p1)
}
 0x220   :  { %741 = dma.vmem_to_hbm [thread:$0]  %s739_s12, 128, %s1152_s5, [#allocation4]  }
 0x221   :  { %1021 = dma.done.wait [#allocation4], 128  }
 0x222   :  { %1022 = vsyncadd [#allocation4], 4294967168 }
 0x223   :  { %745 = vsyncpa [#allocation3], 1 }
 0x224   :  { %746 = vsyncpa [#allocation4], 1 }

</bundles_post_ra>
